<compile_context>
chip_gen: v6e
topology: v6e:2x2x1
jax: 0.10.0
libtpu: 0.0.40
codegen_flags: <defaults>
</compile_context>

<pallas_src>
import functools

import jax
import jax.numpy as jnp
from jax.experimental import pallas as pl
from jax.experimental.pallas import tpu as pltpu


_LANE = 128
_TARGET_BLOCK_BYTES = 2 << 20      # ~2 MiB of input per grid step (native dtype)
_VMEM_LIMIT_BYTES = 48 << 20       # explicit scoped-VMEM limit, safe on all gens
_EPS = 1e-5


def _round_up(x, m):
    return -(-x // m) * m


def _mape_partial_kernel(yt_ref, yp_ref, out_ref, *, tile_rows, lane,
                         valid_rows, ragged):
    """Per-tile partial sum of |yt - yp| / max(|yt|, eps) as an (8, lane) vreg."""
    # Native-dtype load, f32 math in-kernel (v5e VPU has no bf16 anyway).
    yt = yt_ref[...].astype(jnp.float32)
    yp = yp_ref[...].astype(jnp.float32)

    denom = jnp.maximum(jnp.abs(yt), jnp.float32(_EPS))
    # approx=False -> exact divide/Newton on the VPU (not the single EUP vrcp).
    # Kept exact for tolerance parity with the torch reference.
    ape = jnp.abs(yt - yp) * pl.reciprocal(denom, approx=False)

    def to_vreg_partial(x):
        if tile_rows % 8 == 0:
            # Pure-VPU reduction of the tile down to one (8, lane) vreg.
            return x.reshape(tile_rows // 8, 8, lane).sum(axis=0)
        # Tiny-input path (single tile covering the whole array, rows % 8 != 0):
        # reduce over sublanes, park the result in row 0 of an (8, lane) vreg.
        s = jnp.sum(x, axis=0, keepdims=True)                    # (1, lane)
        rid = jax.lax.broadcasted_iota(jnp.int32, (8, lane), 0)
        return jnp.where(rid == 0, s, jnp.float32(0.0))          # (8, lane)

    if not ragged:
        out_ref[...] = to_vreg_partial(ape).reshape(1, 8, lane)
    else:
        i = pl.program_id(0)
        last = pl.num_programs(0) - 1

        @pl.when(i != last)
        def _():
            # Full tiles: unmasked, minimal-VPU path.
            out_ref[...] = to_vreg_partial(ape).reshape(1, 8, lane)

        @pl.when(i == last)
        def _():
            # Ragged last tile only: rows past the end of the real data hold
            # unspecified values; the select keeps garbage/NaN from propagating.
            rows_left = valid_rows - i * tile_rows
            row = jax.lax.broadcasted_iota(jnp.int32, (tile_rows, lane), 0)
            masked = jnp.where(row < rows_left, ape, jnp.float32(0.0))
            out_ref[...] = to_vreg_partial(masked).reshape(1, 8, lane)


def mape_loss(y_true, y_pred, *, tile_rows=None, lane=_LANE):
    """Pallas TPU implementation of MAPELoss.forward(y_true, y_pred)."""
    assert y_true.shape == y_pred.shape
    total = y_true.size
    assert total > 0

    itemsize = min(jnp.dtype(y_true.dtype).itemsize,
                   jnp.dtype(y_pred.dtype).itemsize)
    sub = 16 if itemsize < 4 else 8         # sublane alignment for packed dtypes

    rows = total // lane
    tail = total - rows * lane              # <= lane-1 leftover elements
    flat_t = y_true.reshape(-1)
    flat_p = y_pred.reshape(-1)

    sum_main = jnp.float32(0.0)
    if rows > 0:
        main = rows * lane
        # Aligned case: free reshape, zero copies.  Misaligned case: the kernel
        # eats the 128-aligned prefix and the tiny tail is folded in below
        # (no jnp.pad full read+write of the inputs).
        yt2 = (flat_t if tail == 0 else flat_t[:main]).reshape(rows, lane)
        yp2 = (flat_p if tail == 0 else flat_p[:main]).reshape(rows, lane)

        if tile_rows is None:
            # ~2 MiB of native-dtype input per grid step; raise (e.g. 8192 for
            # f32) on v7x if the last few % of HBM roofline matter.
            tile_rows = max(sub, _TARGET_BLOCK_BYTES // (lane * itemsize))
        tile_rows = max(sub, (tile_rows // sub) * sub)

        if rows <= sub:
            tile_rows = rows                # one tiny tile covers everything
        elif rows <= 2 * tile_rows:
            # Mid-size input: two balanced, aligned tiles so v7x megacore can
            # shard the (stateless, "parallel") grid across both TensorCores.
            tile_rows = min(_round_up(_round_up(rows, 2) // 2, sub), rows)

        num_tiles = pl.cdiv(rows, tile_rows)
        ragged = num_tiles * tile_rows != rows   # only the last tile, if any

        kernel = functools.partial(
            _mape_partial_kernel, tile_rows=tile_rows, lane=lane,
            valid_rows=rows, ragged=ragged)

        cost = pl.CostEstimate(
            flops=6 * main,
            transcendentals=main,           # the reciprocal
            bytes_accessed=main * (jnp.dtype(y_true.dtype).itemsize
                                   + jnp.dtype(y_pred.dtype).itemsize)
            + num_tiles * 8 * lane * 4)

        partials = pl.pallas_call(
            kernel,
            out_shape=jax.ShapeDtypeStruct((num_tiles, 8, lane), jnp.float32),
            grid_spec=pltpu.PrefetchScalarGridSpec(
                num_scalar_prefetch=0,
                grid=(num_tiles,),
                in_specs=[
                    pl.BlockSpec((tile_rows, lane), lambda i: (i, 0)),
                    pl.BlockSpec((tile_rows, lane), lambda i: (i, 0)),
                ],
                out_specs=pl.BlockSpec((1, 8, lane), lambda i: (i, 0, 0)),
            ),
            compiler_params=pltpu.CompilerParams(
                # Per-tile partials are independent -> megacore-shardable.
                dimension_semantics=("parallel",),
                vmem_limit_bytes=_VMEM_LIMIT_BYTES,
            ),
            cost_estimate=cost,
        )(yt2, yp2)

        # Tiny final reduce (num_tiles * 4 KiB) in the wrapper.
        sum_main = jnp.sum(partials)

    if tail > 0:
        # <=127 leftover elements: negligible wrapper-side math.
        yt_t = flat_t[rows * lane:].astype(jnp.float32)
        yp_t = flat_p[rows * lane:].astype(jnp.float32)
        sum_tail = jnp.sum(
            jnp.abs(yt_t - yp_t) / jnp.maximum(jnp.abs(yt_t), jnp.float32(_EPS)))
    else:
        sum_tail = jnp.float32(0.0)

    return (sum_main + sum_tail) / jnp.float32(total)


if __name__ == "__main__":
    key = jax.random.PRNGKey(0)
    k1, k2, k3, k4, k5, k6 = jax.random.split(key, 6)

    def ref_mape(yt, yp):
        return jnp.mean(
            jnp.abs((yt - yp) / jnp.maximum(jnp.abs(yt), jnp.float32(1e-5))))

    # 1) Primary check: NCHW regression target [2, 4, 16, 16] (128-aligned;
    #    split into two balanced tiles -> both TCs busy on v7x).
    shape = (2, 4, 16, 16)
    y_true = jax.random.normal(k1, shape, dtype=jnp.float32)
    y_pred = y_true + 0.1 * jax.random.normal(k2, shape, dtype=jnp.float32)
    mape = mape_loss(y_true, y_pred)
    jax.block_until_ready(mape)
    r1 = ref_mape(y_true, y_pred)
    assert jnp.allclose(mape, r1, rtol=1e-5, atol=1e-6), (mape, r1)

    # 2) Multi-tile grid with a ragged last tile (exercises the pl.when
    #    last-step-only mask path).
    shape2 = (20, 128)
    yt_b = jax.random.normal(k3, shape2, dtype=jnp.float32)
    yp_b = yt_b + 0.05 * jax.random.normal(k4, shape2, dtype=jnp.float32)
    mape2 = mape_loss(yt_b, yp_b, tile_rows=16)
    jax.block_until_ready(mape2)
    r2 = ref_mape(yt_b, yp_b)
    assert jnp.allclose(mape2, r2, rtol=1e-5, atol=1e-6), (mape2, r2)

    # 3) Non-128-aligned element count (exercises the aligned-prefix kernel +
    #    tiny wrapper-side tail that replaced the jnp.pad full copy).
    shape3 = (10, 130)   # 1300 elements: 10 full lane-rows + 20-element tail
    yt_c = jax.random.normal(k5, shape3, dtype=jnp.float32)
    yp_c = yt_c + 0.2 * jax.random.normal(k6, shape3, dtype=jnp.float32)
    mape3 = mape_loss(yt_c, yp_c)
    jax.block_until_ready(mape3)
    r3 = ref_mape(yt_c, yp_c)
    assert jnp.allclose(mape3, r3, rtol=1e-5, atol=1e-6), (mape3, r3)

    print("KERNEL_OK")
</pallas_src>

<mosaic_0001>
module attributes {stable_mosaic.version = 11 : i64} {
  func.func @_mape_partial_kernel(%arg0: i32, %arg1: memref<8x128xf32, #tpu.memory_space<vmem>>, %arg2: memref<8x128xf32, #tpu.memory_space<vmem>>, %arg3: memref<1x8x128xf32, #tpu.memory_space<vmem>>) attributes {dimension_semantics = [#tpu.dimension_semantics<parallel>], iteration_bounds = array<i64: 2>, scalar_prefetch = 0 : i64, scratch_operands = 0 : i64, tpu.core_type = #tpu.core_type<tc>, window_params = [{transform_indices = @transform_0, window_bounds = array<i64: 8, 128>}, {transform_indices = @transform_1, window_bounds = array<i64: 8, 128>}, {transform_indices = @transform_2, window_bounds = array<i64: 1, 8, 128>}]} {
    %c0 = arith.constant 0 : index
    %c0_0 = arith.constant 0 : index
    %0 = vector.load %arg1[%c0, %c0_0] : memref<8x128xf32, #tpu.memory_space<vmem>>, vector<8x128xf32>
    %c0_1 = arith.constant 0 : index
    %c0_2 = arith.constant 0 : index
    %1 = vector.load %arg2[%c0_1, %c0_2] : memref<8x128xf32, #tpu.memory_space<vmem>>, vector<8x128xf32>
    %2 = math.absf %0 : vector<8x128xf32>
    %cst = arith.constant 9.99999974E-6 : f32
    %3 = vector.broadcast %cst : f32 to vector<8x128xf32>
    %4 = arith.maximumf %2, %3 : vector<8x128xf32>
    %5 = arith.subf %0, %1 : vector<8x128xf32>
    %6 = math.absf %5 : vector<8x128xf32>
    %7 = tpu.reciprocal %4 : vector<8x128xf32> -> vector<8x128xf32>
    %8 = arith.mulf %6, %7 : vector<8x128xf32>
    %9 = vector.shape_cast %8 : vector<8x128xf32> to vector<1x8x128xf32>
    %cst_3 = arith.constant dense<0.000000e+00> : vector<8x128xf32>
    %10 = vector.multi_reduction <add>, %9, %cst_3 [0] : vector<1x8x128xf32> to vector<8x128xf32>
    %11 = vector.shape_cast %10 : vector<8x128xf32> to vector<1x8x128xf32>
    %c0_4 = arith.constant 0 : index
    %c0_5 = arith.constant 0 : index
    %c0_6 = arith.constant 0 : index
    %12 = vector.load %arg3[%c0_4, %c0_5, %c0_6] : memref<1x8x128xf32, #tpu.memory_space<vmem>>, vector<1x8x128xf32>
    tpu.vector_store %arg3[%c0_4, %c0_5, %c0_6], %11 {strides = array<i32>} : memref<1x8x128xf32, #tpu.memory_space<vmem>>, vector<1x8x128xf32>,
    return
  }
  func.func @transform_0(%arg0: i32) -> (i32, i32) {
    %c0_i32 = arith.constant 0 : i32
    %c0_i32_0 = arith.constant 0 : i32
    return %arg0, %c0_i32 : i32, i32
  }
  func.func @transform_1(%arg0: i32) -> (i32, i32) {
    %c0_i32 = arith.constant 0 : i32
    %c0_i32_0 = arith.constant 0 : i32
    return %arg0, %c0_i32 : i32, i32
  }
  func.func @transform_2(%arg0: i32) -> (i32, i32, i32) {
    %c0_i32 = arith.constant 0 : i32
    %c0_i32_0 = arith.constant 0 : i32
    %c0_i32_1 = arith.constant 0 : i32
    return %arg0, %c0_i32, %c0_i32_0 : i32, i32, i32
  }
}

</mosaic_0001>

<bundles_post_ra>
// kernel: tpu_custom_call.1
= control target key start
LH: loop header
LB: loop body
LE: loop exit
PB: predicated region body
PF: predicated region fallthrough
CT: control target
= control target key end

     0   :  { %7 = vsyncpa [#allocation3], 0  ;;  %s719_s0 = inlined_call_operand.hbm [shape: f32[16,128], index: 0, kind: input, shape index: {}]   ;;  %s720_s1 = inlined_call_operand.hbm [shape: f32[16,128], index: 1, kind: input, shape index: {}]   ;;  %s721_s2 = inlined_call_operand.hbm [shape: f32[2,8,128], index: 2, kind: output, shape index: {}]  }
   0x1   :  { %9 = vsyncpa [#allocation3 + $0x1], 0 }
   0x2   :  { %10 = vsyncpa [#allocation6], 0 }
   0x3   :  { %12 = vsyncpa [#allocation6 + $0x1], 0 }
   0x4   :  { %13 = vsyncpa [#allocation4], 0 }
   0x5   :  { %15 = vsyncpa [#allocation4 + $0x1], 0  ;;  %s525_s9 = smov 0   ;;  %s527_s10 = smov 0  }
   0x6   :  { %s529_s11 = smov 0   ;;  %s531_s12 = smov 0  }
   0x7 LB: > { %s546_s13 = sadd.s32 4294967295, %s505_s12   ;;  %s313_s14 = sadd.s32 4294967294, %s505_s12   ;;  %s505_s12 = sphi %s531_s12, %s740_s12   ;;  %s501_s11 = sphi %s529_s11, %s739_s11   ;;  %s497_s10 = sphi %s527_s10, %s738_s10   ;;  %s493_s9 = sphi %s525_s9, %s737_s9  }
   0x8   : > { %s550_s15 = sadd.s32 1, %s505_s12   ;;  %s28_s16 = sadd.s32 1, %s501_s11 }
   0x9   : > { %s25_s17 = ssub.s32 %s505_s12, %s550_s15  ;;  %p35_p0 = scmp.ne.s32.totalorder %s501_s11, %s497_s10 }
   0xa   : > { %p26_p1 = scmp.eq.s32.totalorder %s25_s17, 0  ;;  %p36_p2 = scmp.eq.s32.totalorder %s505_s12, 0 }
   0xb   : > { %p41_p3 = scmp.ne.s32.totalorder %s497_s10, %s493_s9  ;;  %p42_p4 = scmp.eq.s32.totalorder %s546_s13, 0 }
   0xc   : > { %s562_s18 = scalar_select %p26_p1, %s501_s11, %s28_s16  }
   0xd   : > { %p564_p5 = por %p36_p2, %p35_p0  ;;  %p568_p6 = por %p42_p4, %p41_p3 }
   0xe   : > { %p91_p7 = scmp.eq.s32.totalorder %s546_s13, 1  ;;  %p97_p8 = scmp.eq.s32.totalorder %s313_s14, 1 }
   0xf   : > { %s725_s20 = scalar_select %p568_p6, 1, 0 }
  0x10   : > { %p345_p10 = scmp.lt.s32.totalorder %s505_s12, 2  ;;  %p575_p11 = por %p91_p7, %p35_p0 }
  0x11   : > { %p579_p12 = por %p97_p8, %p41_p3  ;;  %s584_s23 = sand.u32 1, %s501_s11  }
  0x12   : > { %s726_s21 = scalar_select %p575_p11, 1, 0 }
  0x13   : > { %s727_s22 = scalar_select %p579_p12, 1, 0 }
  0x14   : > { %s317_s24 = sshll.u32 %s505_s12, 7  ;;  %s316_s25 = sshll.u32 %s584_s23, 3 }
  0x15   : > { %s593_s28 = scalar_lea.hbm %s719_s0, %s317_s24  ;;  %s121_s29 = scalar_lea.vmem [#allocation2], %s316_s25 }
  0x16   : > { %s128_s30 = sshll.u32 %s121_s29, 4  ;;  %p599_p13 = pnand %p345_p10, %p564_p5  ;;  %s603_s30 = int_to_ptr.vmem [resolvable:$true] %s128_s30 }
  0x17   : > { %s118_s4 = scalar_lea.sflag [#allocation3], %s584_s23  ;;  %s381_s5 = scalar_lea.hbm %s593_s28, 128 }
  0x18   : > { %p382_p2 = scmp.ne.s32.totalorder %s593_s28, %s381_s5  ;;  %p383_p3 = pneg %p599_p13 }
  0x19   : > { %s386_s8 = scalar_lea.hbm %s719_s0, 256  ;;  %p387_p5 = scmp.lt.s32.totalorder %s593_s28, %s719_s0 }
  0x1a   : > { %p384_p4 = pnand %p383_p3, %p382_p2  ;;  %p388_p8 = scmp.lt.s32.totalorder %s386_s8, %s381_s5 }
  0x1c   : > { %p385_p7 = pneg %p384_p4  ;;  %p389_p10 = por %p388_p8, %p387_p5 }
  0x1e   : > { %p390_p9 = pnand %p389_p10, %p385_p7 }
  0x20   : > { %393 = shalt.err (!%p390_p9)
}
  0x21   : > { %s394_s17 = scalar_lea.vmem %s603_s30, 128  ;;  %s507_s19 = smov [#allocation2]  }
  0x22   : > { %p395_p0 = scmp.ne.s32.totalorder %s603_s30, %s394_s17  ;;  %s399_s26 = sshll.u32 %s507_s19, 4  ;;  %s400_s26 = int_to_ptr.vmem [resolvable:$false] %s399_s26 }
  0x23   : > { %s401_s27 = scalar_lea.vmem %s400_s26, 256  ;;  %p402_p1 = scmp.lt.s32.totalorder %s603_s30, %s400_s26 }
  0x24   : > { %p397_p2 = pnand %p395_p0, %p383_p3  ;;  %p403_p12 = scmp.lt.s32.totalorder %s401_s27, %s394_s17 }
  0x26   : > { %p398_p4 = pneg %p397_p2  ;;  %p404_p11 = por %p403_p12, %p402_p1 }
  0x28   : > { %p405_p5 = pnand %p404_p11, %p398_p4 }
  0x2a   : > { %408 = shalt.err (!%p405_p5)
}
  0x2b   : > { %337 = dma.hbm_to_vmem [thread:$0]  (!%p599_p13), %s593_s28, 128, %s603_s30, %s118_s4  }
  0x2c   : > { %p729_p9 = scmp.lt.s32.totalorder %s505_s12, 3  ;;  %p730_p0 = scmp.ge.s32.totalorder %s505_s12, 1 }
  0x2d   : > { %s645_s7 = scalar_lea.hbm %s720_s1, %s317_s24  ;;  %s139_s8 = scalar_lea.vmem [#allocation5], %s316_s25 }
  0x2e   : > { %p636_p7 = pnand %p730_p0, %p729_p9  ;;  %s146_s14 = sshll.u32 %s139_s8, 4  ;;  %s147_s14 = int_to_ptr.vmem [resolvable:$true] %s146_s14 }
  0x2f   : > { %s136_s28 = scalar_lea.sflag [#allocation6], %s584_s23  ;;  %s409_s30 = scalar_lea.hbm %s645_s7, 128 }
  0x30   : > { %s731_s29 = scalar_select %p636_p7, 1, 0 }
  0x31   : > { %p410_p11 = scmp.ne.s32.totalorder %s645_s7, %s409_s30  ;;  %s414_s17 = scalar_lea.hbm %s720_s1, 256 }
  0x32   : > { %p415_p8 = scmp.lt.s32.totalorder %s645_s7, %s720_s1  ;;  %p416_p10 = scmp.lt.s32.totalorder %s414_s17, %s409_s30 }
  0x33   : > { %p412_p12 = pnand %p410_p11, %p383_p3 }
  0x34   : > { %p417_p2 = por %p416_p10, %p415_p8 }
  0x35   : > { %p413_p1 = pneg %p412_p12 }
  0x37   : > { %p418_p4 = pnand %p417_p2, %p413_p1 }
  0x39   : > { %421 = shalt.err (!%p418_p4)
}
  0x3a   : > { %s422_s25 = scalar_lea.vmem %s147_s14, 128  ;;  %s508_s23 = smov [#allocation5]  }
  0x3b   : > { %p423_p5 = scmp.ne.s32.totalorder %s147_s14, %s422_s25  ;;  %s427_s26 = sshll.u32 %s508_s23, 4  ;;  %s428_s26 = int_to_ptr.vmem [resolvable:$false] %s427_s26 }
  0x3c   : > { %s429_s27 = scalar_lea.vmem %s428_s26, 256  ;;  %p430_p11 = scmp.lt.s32.totalorder %s147_s14, %s428_s26 }
  0x3d   : > { %p425_p9 = pnand %p423_p5, %p383_p3  ;;  %p431_p12 = scmp.lt.s32.totalorder %s429_s27, %s422_s25 }
  0x3f   : > { %p426_p0 = pneg %p425_p9  ;;  %p432_p6 = por %p431_p12, %p430_p11 }
  0x41   : > { %p433_p7 = pnand %p432_p6, %p426_p0 }
  0x43   : > { %436 = shalt.err (!%p433_p7)
}
  0x44   : > { %340 = dma.hbm_to_vmem [thread:$0]  (!%p599_p13), %s645_s7, 128, %s147_s14, %s136_s28  }
  0x45   : > { %p732_p1 = scmp.ne.s32.totalorder %s731_s29, 0 }
  0x46   : > { %s671_s5 = sand.u32 (!%p732_p1), 1, %s497_s10   ;;  %p733_p3 = scmp.ne.s32.totalorder (!%p732_p1), %s725_s20, 0 }
  0x47   : > { %155 = sbr.rel (%p732_p1) target bundleno = 113 (0x71), region = 28  ;;  %s321_s6 = sshll.u32 (!%p732_p1), %s671_s5, 3 }
  0x48   : > { %s158_s8 = scalar_lea.sflag (!%p732_p1), [#allocation3], %s671_s5  ;;  %s161_s30 = scalar_lea.vmem (!%p732_p1), [#allocation2], %s321_s6 }
  0x4c   : > { %480 = dma.done.wait (%p733_p3), %s158_s8, 128  }
  0x4d   : > { %482 = vsyncadd (%p733_p3), %s158_s8, 4294967168  ;;  %s167_s3 = scalar_lea.sflag [#allocation6], %s671_s5  ;;  %s170_s7 = scalar_lea.vmem [#allocation5], %s321_s6 }
  0x4e   : > { %484 = dma.done.wait (%p733_p3), %s167_s3, 128  }
  0x4f   : > { %486 = vsyncadd (%p733_p3), %s167_s3, 4294967168  ;;  %v196_v0 = vld [vmem:[%s161_s30] sm:$0xff]  ;;  %v197_v3 = vld [vmem:[%s170_s7] sm:$0xff]  ;;  %s195_s29 = scalar_lea.vmem [#allocation7], %s321_s6  ;;  %s325_s28 = sshll.u32 %s546_s13, 7 }
  0x50   : > { %v198_v1 = vand.u32 2147483647, %v196_v0  ;;  %v200_v4 = vsub.f32 %v196_v0, %v197_v3  ;;  %s220_s14 = sshll.u32 %s195_s29, 4  ;;  %s218_s20 = scalar_lea.hbm %s721_s2, %s325_s28  ;;  %s221_s14 = int_to_ptr.vmem [resolvable:$true] %s220_s14 }
  0x51   : > { %s207_s17 = scalar_lea.sflag [#allocation4], %s671_s5  ;;  %s437_s24 = scalar_lea.vmem %s221_s14, 128 }
  0x52   : > { %v199_v2 = vmax.f32 %v198_v1, 1e-05  ;;  %v201_v5 = vand.u32 2147483647, %v200_v4  ;;  %p438_p6 = scmp.ne.s32.totalorder %s221_s14, %s437_s24  ;;  %p734_p13 = scmp.ne.s32.totalorder %s726_s21, 0 }
  0x53   : > { %s509_s19 = smov [#allocation7]  }
  0x54   : > { %379 = vrcp.f32 %v199_v2  ;;  %p439_p7 = pnand %p438_p6, %p734_p13  ;;  %s441_s25 = sshll.u32 %s509_s19, 4  ;;  %s442_s25 = int_to_ptr.vmem [resolvable:$false] %s441_s25 }
  0x55   : > { %s443_s23 = scalar_lea.vmem %s442_s25, 256  ;;  %p444_p10 = scmp.lt.s32.totalorder %s221_s14, %s442_s25 }
  0x56   : > { %p440_p8 = pneg %p439_p7  ;;  %p445_p2 = scmp.lt.s32.totalorder %s443_s23, %s437_s24 }
  0x58   : > { %p446_p4 = por %p445_p2, %p444_p10 }
  0x5a   : > { %p447_p5 = pnand %p446_p4, %p440_p8 }
  0x61   : > { %v380_v6 = vpop.eup %379 }
  0x62   : > { %v203_v7 = vmul.f32 %v380_v6, %v201_v5 }
  0x64   : > { %205 = vst [vmem:[%s195_s29] sm:$0xff] %v203_v7 }
  0x65   : > { %450 = shalt.err (!%p447_p5)
}
  0x66   : > { %s451_s13 = scalar_lea.hbm %s218_s20, 128  ;;  %s455_s5 = scalar_lea.hbm %s721_s2, 256 }
  0x67   : > { %p452_p9 = scmp.ne.s32.totalorder %s218_s20, %s451_s13  ;;  %p456_p12 = scmp.lt.s32.totalorder %s218_s20, %s721_s2 }
  0x68   : > { %p457_p1 = scmp.lt.s32.totalorder %s455_s5, %s451_s13 }
  0x69   : > { %p453_p0 = pnand %p452_p9, %p734_p13 }
  0x6a   : > { %p458_p3 = por %p457_p1, %p456_p12 }
  0x6b   : > { %p454_p11 = pneg %p453_p0 }
  0x6d   : > { %p459_p6 = pnand %p458_p3, %p454_p11 }
  0x6f   : > { %462 = shalt.err (!%p459_p6)
}
  0x70   : > { %332 = dma.vmem_to_hbm [thread:$0]  (%p734_p13), %s221_s14, 128, %s218_s20, %s207_s17  }
  0x71 PF: > { %s232_s30 = sand.u32 1, %s493_s9   ;;  %p735_p7 = scmp.ne.s32.totalorder %s727_s22, 0 }
  0x72   : > { %p736_p8 = scmp.ge.s32.totalorder %s505_s12, 2  ;;  %s233_s3 = scalar_lea.sflag [#allocation4], %s232_s30 }
  0x74   : > { %p342_p10 = pnand %p736_p8, %p735_p7 }
  0x76   : > { %p343_p2 = pneg %p342_p10 }
  0x78   : > { %488 = dma.done.wait (%p343_p2), %s233_s3, 128  }
  0x79   : > { %490 = vsyncadd (%p343_p2), %s233_s3, 4294967168  ;;  %p18_p4 = scmp.ge.s32.totalorder %s550_s15, 4   ;;  %s737_s9 = smov %s497_s10 }
  0x7a   : > { %s738_s10 = smov %s501_s11  ;;  %s739_s11 = smov %s562_s18 }
  0x7b   : > { %s740_s12 = smov %s550_s15  ;;  %20 = sbr.rel (!%p18_p4) target bundleno = 7 (0x7), region = 86 }
  0x80   :  { %238 = vsyncpa [#allocation3], 1 }
  0x81   :  { %240 = vsyncpa [#allocation3 + $0x1], 1 }
  0x82   :  { %241 = vsyncpa [#allocation6], 1 }
  0x83   :  { %243 = vsyncpa [#allocation6 + $0x1], 1 }
  0x84   :  { %244 = vsyncpa [#allocation4], 1 }
  0x85   :  { %246 = vsyncpa [#allocation4 + $0x1], 1 }

</bundles_post_ra>
